<compile_context>
chip_gen: v7x
topology: tpu7x:2x2x1
jax: 0.10.0
libtpu: 0.0.40
codegen_flags: <defaults>
</compile_context>

<pallas_src>
import jax
import jax.numpy as jnp
from jax.experimental import pallas as pl
from jax.experimental.pallas import tpu as pltpu


def _net_kernel(x_ref, w1_ref, b1_ref, w2_ref, b2_ref, out_ref):
    # x_ref:  (B, F)   w1_ref: (F, H)   b1_ref: (1, H)
    # w2_ref: (H, O)   b2_ref: (1, O)   out_ref: (B, O)
    x = x_ref[...]

    # hidden = sigmoid(x @ W1 + b1)
    h = jnp.dot(x, w1_ref[...], preferred_element_type=jnp.float32)
    h = h + b1_ref[...]                      # broadcast (1, H) over batch
    h = jax.nn.sigmoid(h)

    # logits = hidden @ W2 + b2
    z = jnp.dot(h, w2_ref[...], preferred_element_type=jnp.float32)
    z = z + b2_ref[...]                      # broadcast (1, O) over batch

    # log_softmax along dim=1 (class axis), numerically stable
    z_max = jnp.max(z, axis=-1, keepdims=True)
    shifted = z - z_max
    lse = jnp.log(jnp.sum(jnp.exp(shifted), axis=-1, keepdims=True))
    out_ref[...] = (shifted - lse).astype(out_ref.dtype)


@jax.jit
def net_forward(x, w1, b1, w2, b2):
    """Full forward pass of Net as one grid-less Pallas kernel (all in VMEM).

    b1 must be (1, n_hidden), b2 must be (1, n_output) — created that way in
    init_params, so no per-call reshape is needed.
    """
    B = x.shape[0]
    O = w2.shape[1]
    vmem_spec = pl.BlockSpec(memory_space=pltpu.MemorySpace.VMEM)
    return pl.pallas_call(
        _net_kernel,
        out_shape=jax.ShapeDtypeStruct((B, O), jnp.float32),
        in_specs=[vmem_spec] * 5,
        out_specs=vmem_spec,
    )(x, w1, b1, w2, b2)


def init_params(key, n_feature, n_hidden, n_output):
    """Deterministic init mimicking torch.nn.Linear defaults (U(-1/sqrt(fan_in), ...)).

    Weights are stored as (in_features, out_features) (transpose of torch's
    layout) so the kernel computes y = x @ W + b directly on the MXU. Biases
    are stored pre-shaped as (1, out_features) for broadcast in the kernel.
    """
    k1, k2, k3, k4 = jax.random.split(key, 4)
    lim1 = 1.0 / jnp.sqrt(jnp.float32(n_feature))
    lim2 = 1.0 / jnp.sqrt(jnp.float32(n_hidden))
    w1 = jax.random.uniform(k1, (n_feature, n_hidden), jnp.float32, -lim1, lim1)
    b1 = jax.random.uniform(k2, (1, n_hidden), jnp.float32, -lim1, lim1)
    w2 = jax.random.uniform(k3, (n_hidden, n_output), jnp.float32, -lim2, lim2)
    b2 = jax.random.uniform(k4, (1, n_output), jnp.float32, -lim2, lim2)
    return w1, b1, w2, b2


if __name__ == "__main__":
    # Iris: 4 input features, 3 classes; small hidden layer.
    n_feature, n_hidden, n_output = 4, 20, 3
    batch = 8

    key = jax.random.PRNGKey(0)
    kx, kp = jax.random.split(key)
    x = jax.random.normal(kx, (batch, n_feature), jnp.float32)
    w1, b1, w2, b2 = init_params(kp, n_feature, n_hidden, n_output)

    out = net_forward(x, w1, b1, w2, b2)
    jax.block_until_ready(out)

    # Pure-JAX reference check
    h_ref = jax.nn.sigmoid(x @ w1 + b1)
    z_ref = h_ref @ w2 + b2
    ref = jax.nn.log_softmax(z_ref, axis=1)
    assert out.shape == (batch, n_output)
    assert jnp.allclose(out, ref, atol=1e-5, rtol=1e-5)

    print("KERNEL_OK")
</pallas_src>

<mosaic_0001>
module attributes {stable_mosaic.version = 11 : i64} {
  func.func @_net_kernel(%arg0: memref<8x4xf32, #tpu.memory_space<vmem>>, %arg1: memref<4x20xf32, #tpu.memory_space<vmem>>, %arg2: memref<1x20xf32, #tpu.memory_space<vmem>>, %arg3: memref<20x3xf32, #tpu.memory_space<vmem>>, %arg4: memref<1x3xf32, #tpu.memory_space<vmem>>, %arg5: memref<8x3xf32, #tpu.memory_space<vmem>>) attributes {dimension_semantics = [], scalar_prefetch = 0 : i64, scratch_operands = 0 : i64, tpu.core_type = #tpu.core_type<tc>} {
    %c0 = arith.constant 0 : index
    %c0_0 = arith.constant 0 : index
    %0 = vector.load %arg0[%c0, %c0_0] : memref<8x4xf32, #tpu.memory_space<vmem>>, vector<8x4xf32>
    %c0_1 = arith.constant 0 : index
    %c0_2 = arith.constant 0 : index
    %1 = vector.load %arg1[%c0_1, %c0_2] : memref<4x20xf32, #tpu.memory_space<vmem>>, vector<4x20xf32>
    %cst = arith.constant dense<0.000000e+00> : vector<8x20xf32>
    %2 = tpu.matmul %0, %1, %cst {dimension_numbers = #tpu.dot_dimension_numbers<[1], [0], [0], [1], [0, 0, 1, 1], [], []>} : vector<8x4xf32>, vector<4x20xf32>, vector<8x20xf32> -> vector<8x20xf32>
    %c0_3 = arith.constant 0 : index
    %c0_4 = arith.constant 0 : index
    %3 = vector.load %arg2[%c0_3, %c0_4] : memref<1x20xf32, #tpu.memory_space<vmem>>, vector<1x20xf32>
    %4 = vector.broadcast %3 : vector<1x20xf32> to vector<8x20xf32>
    %5 = arith.addf %2, %4 : vector<8x20xf32>
    %6 = arith.negf %5 : vector<8x20xf32>
    %7 = math.exp %6 : vector<8x20xf32>
    %cst_5 = arith.constant 1.000000e+00 : f32
    %8 = vector.broadcast %cst_5 : f32 to vector<8x20xf32>
    %9 = arith.addf %8, %7 : vector<8x20xf32>
    %10 = arith.divf %8, %9 : vector<8x20xf32>
    %c0_6 = arith.constant 0 : index
    %c0_7 = arith.constant 0 : index
    %11 = vector.load %arg3[%c0_6, %c0_7] : memref<20x3xf32, #tpu.memory_space<vmem>>, vector<20x3xf32>
    %cst_8 = arith.constant dense<0.000000e+00> : vector<8x3xf32>
    %12 = tpu.matmul %10, %11, %cst_8 {dimension_numbers = #tpu.dot_dimension_numbers<[1], [0], [0], [1], [0, 0, 1, 1], [], []>} : vector<8x20xf32>, vector<20x3xf32>, vector<8x3xf32> -> vector<8x3xf32>
    %c0_9 = arith.constant 0 : index
    %c0_10 = arith.constant 0 : index
    %13 = vector.load %arg4[%c0_9, %c0_10] : memref<1x3xf32, #tpu.memory_space<vmem>>, vector<1x3xf32>
    %14 = vector.broadcast %13 : vector<1x3xf32> to vector<8x3xf32>
    %15 = arith.addf %12, %14 : vector<8x3xf32>
    %cst_11 = arith.constant dense<0xFF800000> : vector<8xf32>
    %16 = vector.multi_reduction <maximumf>, %15, %cst_11 [1] : vector<8x3xf32> to vector<8xf32>
    %17 = vector.shape_cast %16 : vector<8xf32> to vector<8x1xf32>
    %18 = vector.broadcast %17 : vector<8x1xf32> to vector<8x3xf32>
    %19 = arith.subf %15, %18 : vector<8x3xf32>
    %20 = math.exp %19 : vector<8x3xf32>
    %cst_12 = arith.constant dense<0.000000e+00> : vector<8xf32>
    %21 = vector.multi_reduction <add>, %20, %cst_12 [1] : vector<8x3xf32> to vector<8xf32>
    %22 = vector.shape_cast %21 : vector<8xf32> to vector<8x1xf32>
    %23 = math.log %22 : vector<8x1xf32>
    %24 = vector.broadcast %23 : vector<8x1xf32> to vector<8x3xf32>
    %25 = arith.subf %19, %24 : vector<8x3xf32>
    %c0_13 = arith.constant 0 : index
    %c0_14 = arith.constant 0 : index
    %26 = vector.load %arg5[%c0_13, %c0_14] : memref<8x3xf32, #tpu.memory_space<vmem>>, vector<8x3xf32>
    tpu.vector_store %arg5[%c0_13, %c0_14], %25 {strides = array<i32>} : memref<8x3xf32, #tpu.memory_space<vmem>>, vector<8x3xf32>,
    return
  }
}

</mosaic_0001>

<bundles_post_ra>
// kernel: net_forward.1
= control target key start
LH: loop header
LB: loop body
LE: loop exit
PB: predicated region body
PF: predicated region fallthrough
CT: control target
= control target key end

     0   :  { %vm33_vm0 = vcmask 1043456   ;;  %vm29_vm1 = vcmask 31744   ;;  %v259_v0 = vmov 0.0   ;;  %vm260_vm2 = vmmov 0   ;;  %s321_s1 = inlined_call_operand.vmem [shape: f32[4,20], index: 1, kind: input, shape index: {}]   ;;  %s322_s0 = inlined_call_operand.vmem [shape: f32[8,4], index: 0, kind: input, shape index: {}]   ;;  %s323_s3 = inlined_call_operand.vmem [shape: f32[20,3], index: 3, kind: input, shape index: {}]   ;;  %s324_s2 = inlined_call_operand.vmem [shape: f32[1,20], index: 2, kind: input, shape index: {}]   ;;  %s325_s4 = inlined_call_operand.vmem [shape: f32[1,3], index: 4, kind: input, shape index: {}]   ;;  %s326_s5 = inlined_call_operand.vmem [shape: f32[8,3], index: 5, kind: output, shape index: {}]  }
   0x1   :  { %231 = vmatprep.subr.mxu0 %v259_v0  ;;  %v21_v1 = vld [vmem:[%s321_s1] sm:$0xf]  ;;  %233 = vmatprep.mubr.msk.f32.mxu0 %vm260_vm2, %v259_v0  ;;  %v261_v3 = vmov 0.0|0.0   ;;  %v114_v5 = vld [vmem:[%s323_s3 + $0x8] sm:$0xff]  ;;  %v115_v7 = vld [vmem:[%s323_s3 + $0x10] sm:$0xf] }
   0x2   :  { %v20_v2 = vld [vmem:[%s322_s0] sm:$0xff]  ;;  %232 = vmatpush3.msk.msra.mxu0 %vm33_vm0, %v21_v1  ;;  %242 = vmatprep.mubr.msk.f32.mxu1 %vm260_vm2, %v259_v0  ;;  %vm123_vm3 = vcmask 162816   ;;  %vm200_vm4 = vcmask 23552  }
   0x3   :  { %234 = vmatmul.mubr.msk.f32.vlgmr.msra.gmra.mrb[0].mxu0 %vm29_vm1, %v20_v2  ;;  %245 = vmatprep.subr.bf16.mxu1 %v261_v3  ;;  %v113_v4 = vld [vmem:[%s323_s3] sm:$0xff] }
   0x4   :  { %v246_v6 = vpack.c.bf16 %v114_v5, %v113_v4  ;;  %v218_v8 = vld [vmem:[%s324_s2] ss:$0 sm:$0xff] }
   0x5   :  { %v222_v16 = vld [vmem:[%s325_s4] ss:$0 sm:$0xff] }
   0x6   :  { %247 = vmatpush3.bf16.msra.mxu1 %v246_v6 }
   0x7   :  { %240 = vmatprep.subr.mxu1 %v259_v0 }
   0xa   :  { %241 = vmatpush3.msk.msra.mxu1 %vm33_vm0, %v115_v7 }
  0xd6   :  { %v103_v9 = vpop.f32.mrb[0].mxu0 }
  0xd7   :  { %v104_v10 = vadd.f32 %v218_v8, %v103_v9  ;;  %v235_v11 = vpop.f32.mrb[1].mxu0 }
  0xd9   :  { %v221_v12 = vmul.f32 -1.442695, %v104_v10 }
  0xdb   :  { %251 = vpow2.f32 %v221_v12 }
  0xe5   :  { %v252_v13 = vpop.eup %251 }
  0xe6   :  { %v110_v14 = vadd.f32 1.0, %v252_v13 }
  0xe8   :  { %253 = vrcp.f32 %v110_v14 }
  0xf2   :  { %v254_v15 = vpop.eup %253 }
  0xf3   :  { %243 = vmatmul.mubr.msk.f32.vlgmr.msra.gmra.mrb[0].mxu1 %vm123_vm3, %v254_v15 }
 0x1c6   :  { %v196_v17 = vpop.f32.mrb[0].mxu1 }
 0x1c7   :  { %v197_v18 = vadd.f32 %v222_v16, %v196_v17  ;;  %v244_v19 = vpop.f32.mrb[1].mxu1 }
 0x1c9   :  { %v201_v20 = vsel %vm200_vm4, %v197_v18, -inf }
 0x1ca   :  { %202 = vmax.xlane.f32.xlu0 %v201_v20 }
 0x257   :  { %v203_v21 = vpop.xlane.xlu0 %202 }
 0x258   :  { %v204_v22 = vsub.f32 %v197_v18, %v203_v21 }
 0x25a   :  { %v205_v23 = vmul.f32 1.442695, %v204_v22 }
 0x25c   :  { %255 = vpow2.f32 %v205_v23 }
 0x266   :  { %v256_v24 = vpop.eup %255 }
 0x267   :  { %v207_v25 = vsel %vm200_vm4, %v256_v24, 0.0 }
 0x268   :  { %208 = vadd.xlane.f32.xlu0 %v207_v25 }
 0x2f5   :  { %v209_v26 = vpop.xlane.xlu0 %208 }
 0x2f6   :  { %257 = vlog2.f32 %v209_v26 }
 0x300   :  { %v258_v27 = vpop.eup %257 }
 0x301   :  { %v211_v28 = vmul.f32 0.6931472, %v258_v27 }
 0x303   :  { %v212_v29 = vsub.f32 %v204_v22, %v211_v28 }
 0x305   :  { %213 = vst.msk [vmem:[%s326_s5] sm:$0xff] %vm200_vm4, %v212_v29 }

</bundles_post_ra>
